<compile_context>
chip_gen: v5e
topology: v5e:2x2
jax: 0.10.0
libtpu: 0.0.40
codegen_flags: <defaults>
</compile_context>

<pallas_src>
import functools

import jax
import jax.numpy as jnp
from jax.experimental import pallas as pl
from jax.experimental.pallas import tpu as pltpu

NEG_INF = -1e30                         # finite, avoids exp(-inf - -inf) NaNs


@functools.lru_cache(maxsize=None)
def _vmem_limit_bytes():
    # v5e/v6e: 128 MiB VMEM per core -> allow ~100 MiB; v7x: 64 MiB -> <=48 MiB.
    try:
        cap = int(pltpu.get_tpu_info().vmem_capacity_bytes)
    except Exception:
        cap = 64 * 1024 * 1024
    return int(max(min(cap - 16 * 1024 * 1024, 100 * 1024 * 1024),
                   32 * 1024 * 1024))


def _cparams(sem):
    return pltpu.CompilerParams(dimension_semantics=sem,
                                vmem_limit_bytes=_vmem_limit_bytes())


# ----------------------------------------------------------------------------
# Kernels 1 & 4: tiled projection  o = x @ W + b   (W pre-transposed, [K, N])
# ----------------------------------------------------------------------------
def proj_bias_kernel(x_ref, w_ref, b_ref, o_ref):
    o_ref[0] = (jnp.dot(x_ref[0], w_ref[...], preferred_element_type=jnp.float32)
                + b_ref[...]).astype(o_ref.dtype)


# ----------------------------------------------------------------------------
# Kernel 2: WanRMSNorm(q, k) + RoPE (rotate-half) + softmax scale, once/token
# ----------------------------------------------------------------------------
def norm_rope_kernel(ext_ref, qin_ref, kin_ref, gq_ref, gk_ref, cos_ref, sin_ref,
                     qo_ref, ko_ref, *, eps, num_heads, scale):
    b = pl.program_id(0)
    li = pl.program_id(1)
    tl = qin_ref.shape[1]
    d = cos_ref.shape[-1]

    ext = ext_ref[b]                                      # RoPE extent = f*h*w
    cos = cos_ref[...]                                    # [tl, d] f32
    sin = sin_ref[...]                                    # [tl, d] f32, sign folded
    pos = li * tl + jax.lax.broadcasted_iota(jnp.int32, (tl, 1), 0)
    keep = pos < ext                                      # rows past extent: identity

    def rms(x, g_ref):                                    # statistics in f32
        xf = x.astype(jnp.float32)
        ms = jnp.mean(xf * xf, axis=-1, keepdims=True)
        return xf * jax.lax.rsqrt(ms + eps) * g_ref[...]

    def rope(xf):                                         # xf: [tl, D] f32
        parts = []
        for h in range(num_heads):                        # d-wide, lane-aligned slices
            xh = xf[:, h * d:(h + 1) * d]
            rot = pltpu.roll(xh, shift=d // 2, axis=1)    # XLU, free slot
            parts.append(xh * cos + rot * sin)
        xr = jnp.concatenate(parts, axis=1)
        return jnp.where(keep, xr, xf)

    qf = rms(qin_ref[0], gq_ref)
    kf = rms(kin_ref[0], gk_ref)
    qo_ref[0] = (rope(qf) * scale).astype(qo_ref.dtype)   # fold softmax scale into q
    ko_ref[0] = rope(kf).astype(ko_ref.dtype)


# ----------------------------------------------------------------------------
# Kernel 3: flash attention (online softmax); RoPE/scale already applied
# ----------------------------------------------------------------------------
def flash_attn_kernel(seq_lens_ref, q_ref, k_ref, v_ref, o_ref, m_sc, l_sc, acc_sc):
    b = pl.program_id(0)
    ki = pl.program_id(3)
    tkv = k_ref.shape[1]

    @pl.when(ki == 0)
    def _():
        m_sc[...] = jnp.full_like(m_sc, NEG_INF)
        l_sc[...] = jnp.zeros_like(l_sc)
        acc_sc[...] = jnp.zeros_like(acc_sc)

    kl = seq_lens_ref[b]                                  # valid key length
    in_range = ki * tkv < kl
    straddle = (ki + 1) * tkv > kl                        # tile crosses the boundary

    def scores():
        # q @ k^T without materializing a transpose; f32 accumulation on MXU
        return jax.lax.dot_general(q_ref[0], k_ref[0], (((1,), (1,)), ((), ())),
                                   preferred_element_type=jnp.float32)

    def update(s):                                        # one online-softmax step
        m_prev = m_sc[...]                                # (tq,128) lane-replicated
        m_new = jnp.maximum(m_prev, jnp.max(s, axis=-1, keepdims=True))
        alpha = jnp.exp(m_prev - m_new)
        p = jnp.exp(s - m_new[:, 0:1])
        l_sc[...] = alpha * l_sc[...] + jnp.sum(p, axis=-1, keepdims=True)
        acc_sc[...] = alpha[:, 0:1] * acc_sc[...] + jnp.dot(
            p.astype(v_ref.dtype), v_ref[0], preferred_element_type=jnp.float32)
        m_sc[...] = m_new

    @pl.when(in_range & jnp.logical_not(straddle))        # common case: no masking
    def _():
        update(scores())

    @pl.when(in_range & straddle)                         # boundary tile: mask keys
    def _():
        s = scores()
        col = ki * tkv + jax.lax.broadcasted_iota(jnp.int32, s.shape, 1)
        update(jnp.where(col < kl, s, NEG_INF))

    @pl.when(ki == pl.num_programs(3) - 1)
    def _():
        l = jnp.maximum(l_sc[:, 0:1], 1e-20)              # guard zero-length seqs
        o_ref[0] = (acc_sc[...] * pl.reciprocal(l)).astype(o_ref.dtype)


# ----------------------------------------------------------------------------
# Wrapper
# ----------------------------------------------------------------------------
def wan_self_attention(x, seq_lens, grid_sizes, params, num_heads, eps=1e-6,
                       tq=512, tkv=512, tl=256, tn=1024, compute_dtype=None):
    B, L, D = x.shape
    n = num_heads
    d = D // n
    half = d // 2
    cdt = compute_dtype if compute_dtype is not None else x.dtype
    wq, bq, wk, bk, wv, bv, wo, bo, gq, gk = params

    # tiles must divide the problem (small demo shapes fall back to full extent)
    tq = tq if L % tq == 0 else L
    tkv = tkv if L % tkv == 0 else L
    tl = tl if L % tl == 0 else L
    tn3 = tn if (3 * D) % tn == 0 else 3 * D
    tno = tn if D % tn == 0 else D

    # ---- fold interleaved->half RoPE channel permutation into W_q / W_k ------
    p_head = jnp.concatenate([jnp.arange(half) * 2, jnp.arange(half) * 2 + 1])
    perm = (jnp.arange(n)[:, None] * d + p_head[None, :]).reshape(-1)
    w_qkv = jnp.concatenate([wq[perm], wk[perm], wv], axis=0).T.astype(cdt)  # [D,3D]
    b_qkv = jnp.concatenate([bq[perm], bk[perm], bv]).reshape(1, 3 * D).astype(jnp.float32)
    gq_p = gq[perm].reshape(1, D).astype(jnp.float32)
    gk_p = gk[perm].reshape(1, D).astype(jnp.float32)
    wo_t = wo.T.astype(cdt)
    bo_r = bo.reshape(1, D).astype(jnp.float32)
    x_c = x.astype(cdt)

    # ---- 1) fused QKV projection, tiled over (B, L, 3D output) ---------------
    qkv = pl.pallas_call(
        proj_bias_kernel,
        out_shape=jax.ShapeDtypeStruct((B, L, 3 * D), cdt),
        grid=(B, L // tl, (3 * D) // tn3),
        in_specs=[
            pl.BlockSpec((1, tl, D), lambda b, l, j: (b, l, 0)),   # x
            pl.BlockSpec((D, tn3), lambda b, l, j: (0, j)),        # W_qkv slab
            pl.BlockSpec((1, tn3), lambda b, l, j: (0, j)),        # bias slab
        ],
        out_specs=pl.BlockSpec((1, tl, tn3), lambda b, l, j: (b, l, j)),
        compiler_params=_cparams(("parallel",) * 3),
    )(x_c, w_qkv, b_qkv)

    # ---- shared [L, d] RoPE tables (half layout, sign folded into sin) -------
    theta = 1.0 / (10000.0 ** (jnp.arange(half, dtype=jnp.float32) * 2.0 / d))
    ang = jnp.arange(L, dtype=jnp.float32)[:, None] * theta[None, :]    # [L, d/2]
    cos_t = jnp.concatenate([jnp.cos(ang), jnp.cos(ang)], axis=-1)      # [L, d]
    sin_t = jnp.concatenate([-jnp.sin(ang), jnp.sin(ang)], axis=-1)     # signed
    rope_ext = jnp.array([int(f) * int(h) * int(w) for (f, h, w) in grid_sizes],
                         dtype=jnp.int32)

    # ---- 2) RMSNorm + RoPE + scale on q and k, once per token ----------------
    q_r, k_r = pl.pallas_call(
        functools.partial(norm_rope_kernel, eps=eps, num_heads=n,
                          scale=float(d) ** -0.5),
        out_shape=[jax.ShapeDtypeStruct((B, L, D), cdt)] * 2,
        grid_spec=pltpu.PrefetchScalarGridSpec(
            num_scalar_prefetch=1,
            grid=(B, L // tl),
            in_specs=[
                pl.BlockSpec((1, tl, D), lambda b, l, e: (b, l, 0)),   # q part of qkv
                pl.BlockSpec((1, tl, D), lambda b, l, e: (b, l, 1)),   # k part of qkv
                pl.BlockSpec((1, D), lambda b, l, e: (0, 0)),          # gq (permuted)
                pl.BlockSpec((1, D), lambda b, l, e: (0, 0)),          # gk (permuted)
                pl.BlockSpec((tl, d), lambda b, l, e: (l, 0)),         # cos
                pl.BlockSpec((tl, d), lambda b, l, e: (l, 0)),         # sin (signed)
            ],
            out_specs=[pl.BlockSpec((1, tl, D), lambda b, l, e: (b, l, 0))] * 2,
        ),
        compiler_params=_cparams(("parallel", "parallel")),
    )(rope_ext, qkv, qkv, gq_p, gk_p, cos_t, sin_t)

    # ---- 3) flash attention: grid (B, heads, Lq, Lkv), KV axis last ----------
    def _last_kv_block(sl_b):
        return jnp.maximum((sl_b + tkv - 1) // tkv - 1, 0)

    def q_map(b, h, qi, ki, sl):
        return (b, qi, h)

    def k_map(b, h, qi, ki, sl):        # clamp -> skip DMA of fully-masked KV tiles
        return (b, jnp.minimum(ki, _last_kv_block(sl[b])), h)

    def v_map(b, h, qi, ki, sl):        # v is read straight out of the qkv buffer
        return (b, jnp.minimum(ki, _last_kv_block(sl[b])), 2 * n + h)

    o = pl.pallas_call(
        flash_attn_kernel,
        out_shape=jax.ShapeDtypeStruct((B, L, D), cdt),
        grid_spec=pltpu.PrefetchScalarGridSpec(
            num_scalar_prefetch=1,
            grid=(B, n, L // tq, L // tkv),
            in_specs=[
                pl.BlockSpec((1, tq, d), q_map),     # q (head sliced by column block)
                pl.BlockSpec((1, tkv, d), k_map),    # k
                pl.BlockSpec((1, tkv, d), v_map),    # v (column block into qkv)
            ],
            out_specs=pl.BlockSpec((1, tq, d), q_map),
            scratch_shapes=[pltpu.VMEM((tq, 128), jnp.float32),   # running max
                            pltpu.VMEM((tq, 128), jnp.float32),   # running denom
                            pltpu.VMEM((tq, d), jnp.float32)],    # accumulator
        ),
        # B and n lead as parallel axes -> megacore sharding on v7x.
        compiler_params=_cparams(("parallel", "parallel", "parallel", "arbitrary")),
    )(seq_lens.astype(jnp.int32), q_r, k_r, qkv)

    # ---- 4) output projection, tiled over (B, L, D output) -------------------
    y = pl.pallas_call(
        proj_bias_kernel,
        out_shape=jax.ShapeDtypeStruct((B, L, D), x.dtype),
        grid=(B, L // tl, D // tno),
        in_specs=[
            pl.BlockSpec((1, tl, D), lambda b, l, j: (b, l, 0)),
            pl.BlockSpec((D, tno), lambda b, l, j: (0, j)),
            pl.BlockSpec((1, tno), lambda b, l, j: (0, j)),
        ],
        out_specs=pl.BlockSpec((1, tl, tno), lambda b, l, j: (b, l, j)),
        compiler_params=_cparams(("parallel",) * 3),
    )(o, wo_t, bo_r)
    return y


# ----------------------------------------------------------------------------
# Pure-JAX reference (mirrors the PyTorch forward, interleaved RoPE form)
# ----------------------------------------------------------------------------
def reference(x, params, seq_lens, grid_sizes, n, d, eps):
    wq, bq, wk, bk, wv, bv, wo, bo, gq, gk = params
    B, L, D = x.shape
    q = x @ wq.T + bq
    k = x @ wk.T + bk
    v = x @ wv.T + bv

    def rms(t, g):
        return t * jax.lax.rsqrt(jnp.mean(t * t, -1, keepdims=True) + eps) * g

    q = rms(q, gq).reshape(B, L, n, d)
    k = rms(k, gk).reshape(B, L, n, d)
    v = v.reshape(B, L, n, d)

    half = d // 2
    theta = 1.0 / (10000.0 ** (jnp.arange(half, dtype=jnp.float32) * 2.0 / d))
    ang = jnp.arange(L, dtype=jnp.float32)[:, None] * theta[None, :]
    cos = jnp.repeat(jnp.cos(ang), 2, axis=-1)              # interleaved [L, d]
    sin = jnp.repeat(jnp.sin(ang), 2, axis=-1)
    ext = jnp.array([int(f) * int(h) * int(w) for (f, h, w) in grid_sizes],
                    dtype=jnp.int32)

    def swap_neg(t):
        t2 = t.reshape(*t.shape[:-1], -1, 2)
        return jnp.stack([-t2[..., 1], t2[..., 0]], axis=-1).reshape(t.shape)

    def rope(t):
        tr = t * cos[None, :, None, :] + swap_neg(t) * sin[None, :, None, :]
        mask = jnp.arange(L)[None, :, None, None] < ext[:, None, None, None]
        return jnp.where(mask, tr, t)

    q = rope(q)
    k = rope(k)
    s = jnp.einsum('blnd,bmnd->bnlm', q, k) * (d ** -0.5)
    mask = jnp.arange(L)[None, None, None, :] < seq_lens[:, None, None, None]
    s = jnp.where(mask, s, -jnp.inf)
    p = jax.nn.softmax(s, axis=-1)
    o = jnp.einsum('bnlm,bmnd->blnd', p, v).reshape(B, L, D)
    return o @ wo.T + bo


# ----------------------------------------------------------------------------
if __name__ == "__main__":
    B, L, D, n = 2, 32, 256, 2        # batch, seq, dim, heads (head_dim = 128)
    d = D // n
    eps = 1e-6

    key = jax.random.PRNGKey(0)
    ks = jax.random.split(key, 11)
    x = jax.random.normal(ks[0], (B, L, D), jnp.float32)
    wq = 0.02 * jax.random.normal(ks[1], (D, D), jnp.float32)
    bq = 0.01 * jax.random.normal(ks[2], (D,), jnp.float32)
    wk = 0.02 * jax.random.normal(ks[3], (D, D), jnp.float32)
    bk = 0.01 * jax.random.normal(ks[4], (D,), jnp.float32)
    wv = 0.02 * jax.random.normal(ks[5], (D, D), jnp.float32)
    bv = 0.01 * jax.random.normal(ks[6], (D,), jnp.float32)
    wo = 0.02 * jax.random.normal(ks[7], (D, D), jnp.float32)
    bo = 0.01 * jax.random.normal(ks[8], (D,), jnp.float32)
    gq = 1.0 + 0.1 * jax.random.normal(ks[9], (D,), jnp.float32)
    gk = 1.0 + 0.1 * jax.random.normal(ks[10], (D,), jnp.float32)
    params = (wq, bq, wk, bk, wv, bv, wo, bo, gq, gk)

    # kl=28 exercises the straddling-mask path; kl=12 exercises the clamped /
    # fully-skipped KV tile path (tkv=16, L=32).
    seq_lens = jnp.array([28, 12], jnp.int32)
    grid_sizes = [(1, 4, 6), (1, 3, 4)]            # RoPE extents 24 and 12

    ref = reference(x, params, seq_lens, grid_sizes, n, d, eps)

    # f32 end-to-end run (tight correctness check)
    out32 = wan_self_attention(x, seq_lens, grid_sizes, params, num_heads=n,
                               eps=eps, tq=16, tkv=16, tl=16)
    out32 = jax.block_until_ready(out32)
    err32 = float(jnp.max(jnp.abs(out32 - ref)))
    assert jnp.allclose(out32, ref, atol=2e-2, rtol=2e-2), f"f32 max_err={err32}"

    # bf16 compute path (production config: bf16 MXU inputs, f32 accumulation)
    outbf = wan_self_attention(x, seq_lens, grid_sizes, params, num_heads=n,
                               eps=eps, tq=16, tkv=16, tl=16,
                               compute_dtype=jnp.bfloat16)
    outbf = jax.block_until_ready(outbf)
    errbf = float(jnp.max(jnp.abs(outbf - ref)))
    assert jnp.allclose(outbf, ref, atol=1e-1, rtol=1e-1), f"bf16 max_err={errbf}"

    print("KERNEL_OK")
</pallas_src>

<mosaic_0001>
module attributes {stable_mosaic.version = 11 : i64} {
  func.func @proj_bias_kernel(%arg0: i32, %arg1: i32, %arg2: i32, %arg3: memref<1x16x256xf32, #tpu.memory_space<vmem>>, %arg4: memref<256x768xf32, #tpu.memory_space<vmem>>, %arg5: memref<1x768xf32, #tpu.memory_space<vmem>>, %arg6: memref<1x16x768xf32, #tpu.memory_space<vmem>>) attributes {dimension_semantics = [#tpu.dimension_semantics<parallel>, #tpu.dimension_semantics<parallel>, #tpu.dimension_semantics<parallel>], iteration_bounds = array<i64: 2, 2, 1>, scalar_prefetch = 0 : i64, scratch_operands = 0 : i64, tpu.core_type = #tpu.core_type<tc>, window_params = [{transform_indices = @transform_0, window_bounds = array<i64: 1, 16, 256>}, {transform_indices = @transform_1, window_bounds = array<i64: 256, 768>}, {transform_indices = @transform_2, window_bounds = array<i64: 1, 768>}, {transform_indices = @transform_3, window_bounds = array<i64: 1, 16, 768>}]} {
    %c0 = arith.constant 0 : index
    %c0_0 = arith.constant 0 : index
    %c0_1 = arith.constant 0 : index
    %0 = vector.load %arg3[%c0, %c0_0, %c0_1] : memref<1x16x256xf32, #tpu.memory_space<vmem>>, vector<1x16x256xf32>
    %1 = vector.shape_cast %0 : vector<1x16x256xf32> to vector<16x256xf32>
    %c0_2 = arith.constant 0 : index
    %c0_3 = arith.constant 0 : index
    %2 = vector.load %arg4[%c0_2, %c0_3] : memref<256x768xf32, #tpu.memory_space<vmem>>, vector<256x768xf32>
    %cst = arith.constant dense<0.000000e+00> : vector<16x768xf32>
    %3 = tpu.matmul %1, %2, %cst {dimension_numbers = #tpu.dot_dimension_numbers<[1], [0], [0], [1], [0, 0, 1, 1], [], []>} : vector<16x256xf32>, vector<256x768xf32>, vector<16x768xf32> -> vector<16x768xf32>
    %c0_4 = arith.constant 0 : index
    %c0_5 = arith.constant 0 : index
    %4 = vector.load %arg5[%c0_4, %c0_5] : memref<1x768xf32, #tpu.memory_space<vmem>>, vector<1x768xf32>
    %5 = vector.broadcast %4 : vector<1x768xf32> to vector<16x768xf32>
    %6 = arith.addf %3, %5 : vector<16x768xf32>
    %c0_6 = arith.constant 0 : index
    %c0_7 = arith.constant 0 : index
    %c0_8 = arith.constant 0 : index
    %7 = vector.load %arg6[%c0_6, %c0_7, %c0_8] : memref<1x16x768xf32, #tpu.memory_space<vmem>>, vector<1x16x768xf32>
    %8 = vector.shape_cast %7 : vector<1x16x768xf32> to vector<16x768xf32>
    %9 = vector.shape_cast %6 : vector<16x768xf32> to vector<1x16x768xf32>
    tpu.vector_store %arg6[%c0_6, %c0_7, %c0_8], %9 {strides = array<i32>} : memref<1x16x768xf32, #tpu.memory_space<vmem>>, vector<1x16x768xf32>,
    return
  }
  func.func @transform_0(%arg0: i32, %arg1: i32, %arg2: i32) -> (i32, i32, i32) {
    %c0_i32 = arith.constant 0 : i32
    %c0_i32_0 = arith.constant 0 : i32
    return %arg0, %arg1, %c0_i32 : i32, i32, i32
  }
  func.func @transform_1(%arg0: i32, %arg1: i32, %arg2: i32) -> (i32, i32) {
    %c0_i32 = arith.constant 0 : i32
    %c0_i32_0 = arith.constant 0 : i32
    return %c0_i32, %arg2 : i32, i32
  }
  func.func @transform_2(%arg0: i32, %arg1: i32, %arg2: i32) -> (i32, i32) {
    %c0_i32 = arith.constant 0 : i32
    %c0_i32_0 = arith.constant 0 : i32
    return %c0_i32, %arg2 : i32, i32
  }
  func.func @transform_3(%arg0: i32, %arg1: i32, %arg2: i32) -> (i32, i32, i32) {
    %c0_i32 = arith.constant 0 : i32
    return %arg0, %arg1, %arg2 : i32, i32, i32
  }
}

</mosaic_0001>

<bundles_post_ra>
// kernel: tpu_custom_call.1
= control target key start
LH: loop header
LB: loop body
LE: loop exit
PB: predicated region body
PF: predicated region fallthrough
CT: control target
= control target key end

     0   :  { %s1496_s0 = inlined_call_operand.hbm [shape: f32[2,32,256], index: 0, kind: input, shape index: {}]   ;;  %s1497_s1 = inlined_call_operand.hbm [shape: f32[256,768], index: 1, kind: input, shape index: {}]   ;;  %s1498_s2 = inlined_call_operand.hbm [shape: f32[1,768], index: 2, kind: input, shape index: {}]   ;;  %s1499_s3 = inlined_call_operand.hbm [shape: f32[2,32,768], index: 3, kind: output, shape index: {}]  }
   0x1   :  { %1505 = sst [smem:[#allocation16_spill]] %s1497_s1 }
   0x2   :  { %1506 = sst [smem:[#allocation17_spill]] %s1498_s2 }
   0x3   :  { %8 = vsyncpa [#allocation3], 0 }
   0x4   :  { %10 = vsyncpa [#allocation3 + $0x1], 0 }
   0x5   :  { %11 = vsyncpa [#allocation6], 0 }
   0x6   :  { %12 = vsyncpa [#allocation4], 0 }
   0x7   :  { %14 = vsyncpa [#allocation4 + $0x1], 0  ;;  %s1258_s12 = smov 0   ;;  %s1260_s13 = smov 0  }
   0x8   :  { %s1262_s14 = smov 0   ;;  %s1264_s15 = smov 0  }
   0x9   :  { %s1266_s16 = smov 0   ;;  %s1268_s17 = smov 0  }
   0xa   :  { %s1270_s18 = smov 0   ;;  %s1272_s19 = smov 0  }
   0xb LB: > { %1507 = sst [smem:[#allocation12_spill]] %s1200_s12  ;;  %s907_s20 = sadd.s32 4294967295, %s1228_s19   ;;  %s1228_s19 = sphi %s1272_s19, %s20_s19   ;;  %s1224_s18 = sphi %s1270_s18, %s1530_s18   ;;  %s1220_s17 = sphi %s1268_s17, %s1529_s17   ;;  %s1216_s16 = sphi %s1266_s16, %s1528_s16   ;;  %s1212_s15 = sphi %s1264_s15, %s1527_s15   ;;  %s1208_s14 = sphi %s1262_s14, %s1526_s14   ;;  %s1204_s13 = sphi %s1260_s13, %s1525_s13   ;;  %s1200_s12 = sphi %s1258_s12, %s1524_s12  }
   0xc   : > { %s908_s21 = sadd.s32 4294967294, %s1228_s19   ;;  %p61_p0 = scmp.ne.s32.totalorder %s1204_s13, %s1200_s12 }
   0xd   : > { %p1302_p1 = scmp.eq.s32.totalorder %s907_s20, 0  ;;  %p1306_p2 = scmp.eq.s32.totalorder %s907_s20, 3 }
   0xe   : > { %p147_p3 = scmp.eq.s32.totalorder %s908_s21, 3  ;;  %p909_p5 = scmp.ge.s32.totalorder %s1228_s19, 1 }
   0xf   : > { %p1312_p4 = por %p1302_p1, %p61_p0  ;;  %p154_p7 = scmp.lt.s32.totalorder %s1228_s19, 5 }
  0x10   : > { %p1317_p6 = por %p147_p3, %p61_p0  ;;  %s1513_s1 = sld [smem:[#allocation16_spill]] }
  0x11   : > { %p1325_p8 = pnand %p909_p5, %p154_p7  ;;  %s1230_s30 = smov [#allocation5]  }
  0x12   : > { %s1511_s25 = scalar_select %p1317_p6, 1, 0 }
  0x13   : > { %p943_p9 = pneg %p1325_p8  ;;  %s170_s4 = sshll.u32 %s1230_s30, 4  ;;  %s171_s4 = int_to_ptr.vmem [resolvable:$true] %s170_s4 }
  0x14   : > { %1512 = sst [smem:[#allocation13_spill]] %s1511_s25  ;;  %s1231_s8 = smov 768  }
  0x15   : > { %p944_p10 = pnand %p943_p9, %p1302_p1  ;;  %s1515_s2 = sld [smem:[#allocation17_spill]] }
  0x16   : > { %s168_s28 = sshll.u32 %s1513_s1, 4  ;;  %s1232_s9 = smov 48   ;;  %s169_s28 = int_to_ptr.hbm [resolvable:$true] %s168_s28 }
  0x17   : > { %946 = dma.hbm_to_vmem [thread:$0]  (!%p944_p10), %s169_s28, 24576, %s171_s4, [#allocation6], %s1231_s8, %s1231_s8, %s1232_s9  }
  0x18   : > { %s1233_s10 = smov [#allocation7]   ;;  %s35_s20 = sadd.s32 1, %s1220_s17 }
  0x19   : > { %s187_s11 = sshll.u32 %s1233_s10, 4  ;;  %s39_s21 = sadd.s32 1, %s1224_s18  ;;  %s188_s11 = int_to_ptr.vmem [resolvable:$true] %s187_s11 }
  0x1a   : > { %p37_p11 = scmp.ge.s32.totalorder %s35_s20, 2  ;;  %s48_s26 = sadd.s32 1, %s1208_s14 }
  0x1b   : > { %s185_s7 = sshll.u32 %s1515_s2, 4  ;;  %p55_p12 = scmp.ne.s32.totalorder %s1208_s14, %s1204_s13  ;;  %s186_s7 = int_to_ptr.hbm [resolvable:$true] %s185_s7 }
  0x1c   : > { %949 = dma.hbm_to_vmem [thread:$0]  (!%p944_p10), %s186_s7, 96, %s188_s11, [#allocation6]  }
  0x1d   : > { %p56_p13 = scmp.eq.s32.totalorder %s1228_s19, 0  ;;  %s1532_s20 = smov (%p37_p11, %s35_s20), 0 }
  0x1e   : > { %1516 = sst [smem:[#allocation14_spill]] %s1532_s20  ;;  %s1534_s21 = smov (!%p37_p11, %s39_s21), %s1224_s18 }
  0x1f   : > { %s44_s27 = ssub.s32 %s1220_s17, %s1532_s20  ;;  %p1347_p0 = por %p56_p13, %p55_p12 }
  0x20   : > { %p41_p3 = scmp.ge.s32.totalorder %s1534_s21, 2  ;;  %p1353_p5 = por %p1306_p2, %p55_p12 }
  0x21   : > { %p960_p7 = scmp.lt.s32.totalorder %s1228_s19, 4  ;;  %s198_s4 = sand.u32 1, %s1208_s14  }
  0x22   : > { %s1518_s30 = scalar_select %p1353_p5, 1, 0 }
  0x23   : > { %s1536_s21 = smov (%p41_p3, %s1534_s21), 0  ;;  %s913_s5 = sshll.u32 %s198_s4, 5 }
  0x24   : > { %1519 = sst [smem:[#allocation15_spill]] %s1518_s30  ;;  %s43_s6 = ssub.s32 %s1224_s18, %s1536_s21 }
  0x25   : > { %s45_s7 = sor.u32 %s44_s27, %s43_s6  ;;  %s927_s8 = sshll.u32 %s1220_s17, 2 }
  0x26   : > { %p46_p9 = scmp.eq.s32.totalorder %s45_s7, 0  ;;  %s916_s9 = sshll.u32 %s1224_s18, 3 }
  0x27   : > { %s208_s10 = sadd.s32 %s927_s8, %s916_s9  ;;  %s202_s11 = scalar_lea.vmem [#allocation2], %s913_s5 }
  0x28   : > { %s213_s23 = sshll.u32 %s202_s11, 4  ;;  %s917_s2 = sshll.u32 %s208_s10, 3  ;;  %s214_s23 = int_to_ptr.vmem [resolvable:$true] %s213_s23 }
  0x29   : > { %s1366_s1 = scalar_select %p46_p9, %s1208_s14, %s48_s26  }
  0x2a   : > { %s210_s12 = scalar_lea.hbm %s1496_s0, %s917_s2  ;;  %p951_p2 = pnand %p960_p7, %p1347_p0 }
  0x2b   : > { %s211_s30 = sshll.u32 %s210_s12, 4  ;;  %s199_s27 = scalar_lea.sflag [#allocation3], %s198_s4  ;;  %s212_s30 = int_to_ptr.hbm [resolvable:$true] %s211_s30 }
  0x2c   : > { %s1234_s6 = smov 256   ;;  %s1235_s7 = smov 16  }
  0x2d   : > { %953 = dma.hbm_to_vmem [thread:$0]  (!%p951_p2), %s212_s30, 512, %s214_s23, %s199_s27, %s1234_s6, %s1234_s6, %s1235_s7  }
  0x2e   : > { %225 = sbr.rel (%p1325_p8) target bundleno = 305 (0x131), region = 32  ;;  %s1378_s26 = sand.u32 (!%p1325_p8), 1, %s1204_s13  }
  0x2f   : > { %s919_s25 = sshll.u32 (!%p1325_p8), %s1378_s26, 5  ;;  %s228_s2 = scalar_lea.sflag (!%p1325_p8), [#allocation3], %s1378_s26 }
  0x30   : > { %s1382_s20 = scalar_lea.vmem (!%p1325_p8), [#allocation2], %s919_s25 }
  0x33   : > { %1187 = dma.done.wait (%p1312_p4), %s228_s2, 512  }
  0x34   : > { %1189 = vsyncadd (%p1312_p4), %s228_s2, 4294966784 }
  0x35   : > { %1191 = dma.done.wait (%p1302_p1), [#allocation6], 24672  }
  0x36   : > { %1193 = vsyncadd (%p1302_p1), [#allocation6], 4294942624  ;;  %v365_v0 = vld [vmem:[#allocation5 + $0x2d8] sm:$0xff]  ;;  %v359_v1 = vld [vmem:[#allocation5 + $0x2a8] sm:$0xff]  ;;  %s928_s12 = smul.u32 96, %s1378_s26  ;;  %s769_s10 = scalar_lea.sflag [#allocation4], %s1378_s26 }
  0x37   : > { %v461_v2 = vld [vmem:[#allocation5 + $0x5d8] sm:$0xff]  ;;  %526 = vmatpush.msra.mxu2 %v365_v0  ;;  %v455_v3 = vld [vmem:[#allocation5 + $0x5a8] sm:$0xff]  ;;  %v364_v4 = vld [vmem:[#allocation5 + $0x2d0] sm:$0xff]  ;;  %s929_s24 = smul.u32 12, %s1212_s15  ;;  %s1146_s7 = scalar_lea.hbm %s1499_s3, 384 }
  0x38   : > { %549 = vmatpush.msra.mxu3 %v461_v2  ;;  %v353_v5 = vld [vmem:[#allocation5 + $0x278] sm:$0xff]  ;;  %480 = vmatpush.msra.mxu0 %v364_v4  ;;  %v358_v7 = vld [vmem:[#allocation5 + $0x2a0] sm:$0xff]  ;;  %v347_v8 = vld [vmem:[#allocation5 + $0x248] sm:$0xff]  ;;  %s1433_s22 = scalar_lea.vmem [#allocation8], %s928_s12  ;;  %s930_s29 = smul.u32 24, %s1216_s16 }
  0x39   : > { %v449_v6 = vld [vmem:[#allocation5 + $0x578] sm:$0xff]  ;;  %527 = vmatpush.msra.mxu2 %v359_v1  ;;  %v460_v9 = vld [vmem:[#allocation5 + $0x5d0] sm:$0xff]  ;;  %v443_v10 = vld [vmem:[#allocation5 + $0x548] sm:$0xff]  ;;  %s786_s8 = sshll.u32 %s1433_s22, 4  ;;  %s787_s8 = int_to_ptr.vmem [resolvable:$true] %s786_s8 }
  0x3a   : > { %550 = vmatpush.msra.mxu3 %v455_v3  ;;  %481 = vmatpush.msra.mxu0 %v358_v7  ;;  %v352_v11 = vld [vmem:[#allocation5 + $0x270] sm:$0xff]  ;;  %v454_v12 = vld [vmem:[#allocation5 + $0x5a0] sm:$0xff]  ;;  %v341_v15 = vld [vmem:[#allocation5 + $0x218] sm:$0xff]  ;;  %s783_s28 = sadd.s32 %s930_s29, %s929_s24 }
  0x3b   : > { %503 = vmatpush.msra.mxu1 %v460_v9  ;;  %528 = vmatpush.msra.mxu2 %v353_v5  ;;  %v346_v13 = vld [vmem:[#allocation5 + $0x240] sm:$0xff]  ;;  %v448_v14 = vld [vmem:[#allocation5 + $0x570] sm:$0xff]  ;;  %v437_v16 = vld [vmem:[#allocation5 + $0x518] sm:$0xff]  ;;  %s924_s30 = sshll.u32 %s783_s28, 3 }
  0x3c   : > { %551 = vmatpush.msra.mxu3 %v449_v6  ;;  %482 = vmatpush.msra.mxu0 %v352_v11  ;;  %v340_v17 = vld [vmem:[#allocation5 + $0x210] sm:$0xff]  ;;  %v442_v18 = vld [vmem:[#allocation5 + $0x540] sm:$0xff]  ;;  %v335_v19 = vld [vmem:[#allocation5 + $0x1e8] sm:$0xff]  ;;  %s785_s16 = scalar_lea.hbm %s1499_s3, %s924_s30 }
  0x3d   : > { %504 = vmatpush.msra.mxu1 %v454_v12  ;;  %529 = vmatpush.msra.mxu2 %v347_v8  ;;  %v431_v20 = vld [vmem:[#allocation5 + $0x4e8] sm:$0xff]  ;;  %v334_v21 = vld [vmem:[#allocation5 + $0x1e0] sm:$0xff]  ;;  %v436_v22 = vld [vmem:[#allocation5 + $0x510] sm:$0xff]  ;;  %s788_s9 = sshll.u32 %s785_s16, 4  ;;  %s789_s9 = int_to_ptr.hbm [resolvable:$true] %s788_s9 }
  0x3e   : > { %552 = vmatpush.msra.mxu3 %v443_v10  ;;  %483 = vmatpush.msra.mxu0 %v346_v13  ;;  %v329_v23 = vld [vmem:[#allocation5 + $0x1b8] sm:$0xff]  ;;  %v328_v25 = vld [vmem:[#allocation5 + $0x1b0] sm:$0xff]  ;;  %v430_v26 = vld [vmem:[#allocation5 + $0x4e0] sm:$0xff]  ;;  %s1140_s11 = sshra.s32 %s789_s9, 4  ;;  %s1141_s11 = int_to_ptr.hbm [resolvable:$true] %s1140_s11 }
  0x3f   : > { %505 = vmatpush.msra.mxu1 %v448_v14  ;;  %530 = vmatpush.msra.mxu2 %v341_v15  ;;  %v425_v24 = vld [vmem:[#allocation5 + $0x4b8] sm:$0xff]  ;;  %v323_v27 = vld [vmem:[#allocation5 + $0x188] sm:$0xff]  ;;  %v322_v29 = vld [vmem:[#allocation5 + $0x180] sm:$0xff]  ;;  %s1142_s23 = scalar_lea.hbm %s1141_s11, 96  ;;  %p1147_p10 = scmp.lt.s32.totalorder %s1141_s11, %s1499_s3 }
  0x40   : > { %553 = vmatpush.msra.mxu3 %v437_v16  ;;  %484 = vmatpush.msra.mxu0 %v340_v17  ;;  %v419_v28 = vld [vmem:[#allocation5 + $0x488] sm:$0xff]  ;;  %v424_v30 = vld [vmem:[#allocation5 + $0x4b0] sm:$0xff]  ;;  %v317_v31 = vld [vmem:[#allocation5 + $0x158] sm:$0xff]  ;;  %p1143_p1 = scmp.ne.s32.totalorder %s1141_s11, %s1142_s23  ;;  %p1148_p11 = scmp.lt.s32.totalorder %s1146_s7, %s1142_s23 }
  0x41   : > { %506 = vmatpush.msra.mxu1 %v442_v18  ;;  %531 = vmatpush.msra.mxu2 %v335_v19  ;;  %v413_v32 = vld [vmem:[#allocation5 + $0x458] sm:$0xff]  ;;  %v316_v33 = vld [vmem:[#allocation5 + $0x150] sm:$0xff]  ;;  %v418_v34 = vld [vmem:[#allocation5 + $0x480] sm:$0xff] }
  0x42   : > { %554 = vmatpush.msra.mxu3 %v431_v20  ;;  %485 = vmatpush.msra.mxu0 %v334_v21  ;;  %v311_v35 = vld [vmem:[#allocation5 + $0x128] sm:$0xff]  ;;  %v310_v37 = vld [vmem:[#allocation5 + $0x120] sm:$0xff]  ;;  %v412_v38 = vld [vmem:[#allocation5 + $0x450] sm:$0xff]  ;;  %p1144_p4 = pnand %p1143_p1, %p1353_p5  ;;  %p1149_p12 = por %p1148_p11, %p1147_p10 }
  0x43   : > { %507 = vmatpush.msra.mxu1 %v436_v22  ;;  %532 = vmatpush.msra.mxu2 %v329_v23  ;;  %v407_v36 = vld [vmem:[#allocation5 + $0x428] sm:$0xff]  ;;  %v305_v39 = vld [vmem:[#allocation5 + $0xf8] sm:$0xff]  ;;  %v304_v41 = vld [vmem:[#allocation5 + $0xf0] sm:$0xff] }
  0x44   : > { %555 = vmatpush.msra.mxu3 %v425_v24  ;;  %486 = vmatpush.msra.mxu0 %v328_v25  ;;  %v401_v40 = vld [vmem:[#allocation5 + $0x3f8] sm:$0xff]  ;;  %v406_v42 = vld [vmem:[#allocation5 + $0x420] sm:$0xff]  ;;  %v299_v43 = vld [vmem:[#allocation5 + $0xc8] sm:$0xff]  ;;  %p1145_p8 = pneg %p1144_p4 }
  0x45   : > { %508 = vmatpush.msra.mxu1 %v430_v26  ;;  %533 = vmatpush.msra.mxu2 %v323_v27  ;;  %v395_v44 = vld [vmem:[#allocation5 + $0x3c8] sm:$0xff]  ;;  %v298_v45 = vld [vmem:[#allocation5 + $0xc0] sm:$0xff]  ;;  %v400_v46 = vld [vmem:[#allocation5 + $0x3f0] sm:$0xff] }
  0x46   : > { %556 = vmatpush.msra.mxu3 %v419_v28  ;;  %487 = vmatpush.msra.mxu0 %v322_v29  ;;  %v293_v47 = vld [vmem:[#allocation5 + $0x98] sm:$0xff]  ;;  %v292_v49 = vld [vmem:[#allocation5 + $0x90] sm:$0xff]  ;;  %v394_v50 = vld [vmem:[#allocation5 + $0x3c0] sm:$0xff]  ;;  %p1150_p13 = pnand %p1149_p12, %p1145_p8 }
  0x47   : > { %509 = vmatpush.msra.mxu1 %v424_v30  ;;  %534 = vmatpush.msra.mxu2 %v317_v31  ;;  %v389_v48 = vld [vmem:[#allocation5 + $0x398] sm:$0xff]  ;;  %v287_v51 = vld [vmem:[#allocation5 + $0x68] sm:$0xff]  ;;  %v286_v53 = vld [vmem:[#allocation5 + $0x60] sm:$0xff] }
  0x48   : > { %557 = vmatpush.msra.mxu3 %v413_v32  ;;  %488 = vmatpush.msra.mxu0 %v316_v33  ;;  %v383_v52 = vld [vmem:[#allocation5 + $0x368] sm:$0xff]  ;;  %v388_v54 = vld [vmem:[#allocation5 + $0x390] sm:$0xff]  ;;  %v281_v55 = vld [vmem:[#allocation5 + $0x38] sm:$0xff] }
  0x49   : > { %510 = vmatpush.msra.mxu1 %v418_v34  ;;  %535 = vmatpush.msra.mxu2 %v311_v35  ;;  %v377_v56 = vld [vmem:[#allocation5 + $0x338] sm:$0xff]  ;;  %v280_v57 = vld [vmem:[#allocation5 + $0x30] sm:$0xff]  ;;  %v382_v58 = vld [vmem:[#allocation5 + $0x360] sm:$0xff] }
  0x4a   : > { %558 = vmatpush.msra.mxu3 %v407_v36  ;;  %489 = vmatpush.msra.mxu0 %v310_v37  ;;  %v275_v59 = vld [vmem:[#allocation5 + $0x8] sm:$0xff]  ;;  %v274_v63 = vld [vmem:[#allocation5] sm:$0xff]  ;;  %v376_v0 = vld [vmem:[#allocation5 + $0x330] sm:$0xff] }
  0x4b   : > { %511 = vmatpush.msra.mxu1 %v412_v38  ;;  %536 = vmatpush.msra.mxu2 %v305_v39  ;;  %v371_v60 = vld [vmem:[#allocation5 + $0x308] sm:$0xff]  ;;  %v361_v1 = vld [vmem:[#allocation5 + $0x2b8] sm:$0xff]  ;;  %v366_v3 = vld [vmem:[#allocation5 + $0x2e0] sm:$0xff] }
  0x4c   : > { %559 = vmatpush.msra.mxu3 %v401_v40  ;;  %490 = vmatpush.msra.mxu0 %v304_v41  ;;  %v367_v61 = vld [vmem:[#allocation5 + $0x2e8] sm:$0xff]  ;;  %v457_v2 = vld [vmem:[#allocation5 + $0x5b8] sm:$0xff]  ;;  %v370_v4 = vld [vmem:[#allocation5 + $0x300] sm:$0xff] }
  0x4d   : > { %512 = vmatpush.msra.mxu1 %v406_v42  ;;  %537 = vmatpush.msra.mxu2 %v299_v43  ;;  %v463_v62 = vld [vmem:[#allocation5 + $0x5e8] sm:$0xff]  ;;  %v360_v7 = vld [vmem:[#allocation5 + $0x2b0] sm:$0xff]  ;;  %v462_v8 = vld [vmem:[#allocation5 + $0x5e0] sm:$0xff] }
  0x4e   : > { %560 = vmatpush.msra.mxu3 %v395_v44  ;;  %491 = vmatpush.msra.mxu0 %v298_v45  ;;  %v355_v5 = vld [vmem:[#allocation5 + $0x288] sm:$0xff]  ;;  %v349_v9 = vld [vmem:[#allocation5 + $0x258] sm:$0xff]  ;;  %v354_v11 = vld [vmem:[#allocation5 + $0x280] sm:$0xff] }
  0x4f   : > { %513 = vmatpush.msra.mxu1 %v400_v46  ;;  %538 = vmatpush.msra.mxu2 %v293_v47  ;;  %v451_v6 = vld [vmem:[#allocation5 + $0x588] sm:$0xff]  ;;  %v445_v10 = vld [vmem:[#allocation5 + $0x558] sm:$0xff]  ;;  %v456_v12 = vld [vmem:[#allocation5 + $0x5b0] sm:$0xff] }
  0x50   : > { %561 = vmatpush.msra.mxu3 %v389_v48  ;;  %492 = vmatpush.msra.mxu0 %v292_v49  ;;  %v343_v13 = vld [vmem:[#allocation5 + $0x228] sm:$0xff]  ;;  %v348_v15 = vld [vmem:[#allocation5 + $0x250] sm:$0xff]  ;;  %v450_v16 = vld [vmem:[#allocation5 + $0x580] sm:$0xff] }
  0x51   : > { %514 = vmatpush.msra.mxu1 %v394_v50  ;;  %539 = vmatpush.msra.mxu2 %v287_v51  ;;  %v439_v14 = vld [vmem:[#allocation5 + $0x528] sm:$0xff]  ;;  %v337_v17 = vld [vmem:[#allocation5 + $0x1f8] sm:$0xff]  ;;  %v342_v19 = vld [vmem:[#allocation5 + $0x220] sm:$0xff] }
  0x52   : > { %562 = vmatpush.msra.mxu3 %v383_v52  ;;  %493 = vmatpush.msra.mxu0 %v286_v53  ;;  %v433_v18 = vld [vmem:[#allocation5 + $0x4f8] sm:$0xff]  ;;  %v444_v20 = vld [vmem:[#allocation5 + $0x550] sm:$0xff]  ;;  %v331_v21 = vld [vmem:[#allocation5 + $0x1c8] sm:$0xff] }
  0x53   : > { %515 = vmatpush.msra.mxu1 %v388_v54  ;;  %540 = vmatpush.msra.mxu2 %v281_v55  ;;  %v427_v22 = vld [vmem:[#allocation5 + $0x4c8] sm:$0xff]  ;;  %v336_v23 = vld [vmem:[#allocation5 + $0x1f0] sm:$0xff]  ;;  %v438_v24 = vld [vmem:[#allocation5 + $0x520] sm:$0xff] }
  0x54   : > { %563 = vmatpush.msra.mxu3 %v377_v56  ;;  %494 = vmatpush.msra.mxu0 %v280_v57  ;;  %v325_v25 = vld [vmem:[#allocation5 + $0x198] sm:$0xff]  ;;  %v330_v27 = vld [vmem:[#allocation5 + $0x1c0] sm:$0xff]  ;;  %v432_v28 = vld [vmem:[#allocation5 + $0x4f0] sm:$0xff] }
  0x55   : > { %516 = vmatpush.msra.mxu1 %v382_v58  ;;  %541 = vmatpush.msra.mxu2 %v275_v59  ;;  %v421_v26 = vld [vmem:[#allocation5 + $0x498] sm:$0xff]  ;;  %v319_v29 = vld [vmem:[#allocation5 + $0x168] sm:$0xff]  ;;  %v324_v31 = vld [vmem:[#allocation5 + $0x190] sm:$0xff] }
  0x56   : > { %564 = vmatpush.msra.mxu3 %v371_v60  ;;  %495 = vmatpush.msra.mxu0 %v274_v63  ;;  %v415_v30 = vld [vmem:[#allocation5 + $0x468] sm:$0xff]  ;;  %v426_v32 = vld [vmem:[#allocation5 + $0x4c0] sm:$0xff]  ;;  %v313_v33 = vld [vmem:[#allocation5 + $0x138] sm:$0xff] }
  0x57   : > { %618 = vmatpush.msrb.mxu2 %v367_v61  ;;  %517 = vmatpush.msra.mxu1 %v376_v0  ;;  %v409_v34 = vld [vmem:[#allocation5 + $0x438] sm:$0xff]  ;;  %v318_v35 = vld [vmem:[#allocation5 + $0x160] sm:$0xff]  ;;  %v420_v36 = vld [vmem:[#allocation5 + $0x490] sm:$0xff] }
  0x58   : > { %641 = vmatpush.msrb.mxu3 %v463_v62  ;;  %572 = vmatpush.msrb.mxu0 %v366_v3  ;;  %v307_v37 = vld [vmem:[#allocation5 + $0x108] sm:$0xff]  ;;  %v312_v39 = vld [vmem:[#allocation5 + $0x130] sm:$0xff]  ;;  %v414_v40 = vld [vmem:[#allocation5 + $0x460] sm:$0xff] }
  0x59   : > { %619 = vmatpush.msrb.mxu2 %v361_v1  ;;  %518 = vmatpush.msra.mxu1 %v370_v4  ;;  %v403_v38 = vld [vmem:[#allocation5 + $0x408] sm:$0xff]  ;;  %v301_v41 = vld [vmem:[#allocation5 + $0xd8] sm:$0xff]  ;;  %v306_v43 = vld [vmem:[#allocation5 + $0x100] sm:$0xff] }
  0x5a   : > { %642 = vmatpush.msrb.mxu3 %v457_v2  ;;  %573 = vmatpush.msrb.mxu0 %v360_v7  ;;  %v397_v42 = vld [vmem:[#allocation5 + $0x3d8] sm:$0xff]  ;;  %v408_v44 = vld [vmem:[#allocation5 + $0x430] sm:$0xff]  ;;  %v295_v45 = vld [vmem:[#allocation5 + $0xa8] sm:$0xff] }
  0x5b   : > { %620 = vmatpush.msrb.mxu2 %v355_v5  ;;  %595 = vmatpush.msrb.mxu1 %v462_v8  ;;  %v391_v46 = vld [vmem:[#allocation5 + $0x3a8] sm:$0xff]  ;;  %v300_v47 = vld [vmem:[#allocation5 + $0xd0] sm:$0xff]  ;;  %v402_v48 = vld [vmem:[#allocation5 + $0x400] sm:$0xff] }
  0x5c   : > { %643 = vmatpush.msrb.mxu3 %v451_v6  ;;  %574 = vmatpush.msrb.mxu0 %v354_v11  ;;  %v289_v49 = vld [vmem:[#allocation5 + $0x78] sm:$0xff]  ;;  %v1393_v51 = vld [vmem:[%s1382_s20] sm:$0xff]  ;;  %v283_v53 = vld [vmem:[#allocation5 + $0x48] sm:$0xff] }
  0x5d   : > { %621 = vmatpush.msrb.mxu2 %v349_v9  ;;  %596 = vmatpush.msrb.mxu1 %v456_v12  ;;  %v385_v50 = vld [vmem:[#allocation5 + $0x378] sm:$0xff]  ;;  %v294_v52 = vld [vmem:[#allocation5 + $0xa0] sm:$0xff]  ;;  %v396_v54 = vld [vmem:[#allocation5 + $0x3d0] sm:$0xff] }
  0x5e   : > { %644 = vmatpush.msrb.mxu3 %v445_v10  ;;  %575 = vmatpush.msrb.mxu0 %v348_v15  ;;  %v379_v55 = vld [vmem:[#allocation5 + $0x348] sm:$0xff]  ;;  %v288_v56 = vld [vmem:[#allocation5 + $0x70] sm:$0xff]  ;;  %v277_v57 = vld [vmem:[#allocation5 + $0x18] sm:$0xff] }
  0x5f   : > { %622 = vmatpush.msrb.mxu2 %v343_v13  ;;  %597 = vmatpush.msrb.mxu1 %v450_v16  ;;  %v1397_v58 = vld [vmem:[%s1382_s20 + $0x8] sm:$0xff]  ;;  %v369_v59 = vld [vmem:[#allocation5 + $0x2f8] sm:$0xff]  ;;  %v390_v60 = vld [vmem:[#allocation5 + $0x3a0] sm:$0xff] }
  0x60   : > { %645 = vmatpush.msrb.mxu3 %v439_v14  ;;  %576 = vmatpush.msrb.mxu0 %v342_v19  ;;  %v373_v61 = vld [vmem:[#allocation5 + $0x318] sm:$0xff]  ;;  %v282_v62 = vld [vmem:[#allocation5 + $0x40] sm:$0xff]  ;;  %v363_v63 = vld [vmem:[#allocation5 + $0x2c8] sm:$0xff] }
  0x61   : > { %623 = vmatpush.msrb.mxu2 %v337_v17  ;;  %598 = vmatpush.msrb.mxu1 %v444_v20  ;;  %v465_v0 = vld [vmem:[#allocation5 + $0x5f8] sm:$0xff]  ;;  %v384_v1 = vld [vmem:[#allocation5 + $0x370] sm:$0xff]  ;;  %v459_v3 = vld [vmem:[#allocation5 + $0x5c8] sm:$0xff] }
  0x62   : > { %646 = vmatpush.msrb.mxu3 %v433_v18  ;;  %577 = vmatpush.msrb.mxu0 %v336_v23  ;;  %v357_v2 = vld [vmem:[#allocation5 + $0x298] sm:$0xff]  ;;  %v276_v4 = vld [vmem:[#allocation5 + $0x10] sm:$0xff]  ;;  %v378_v5 = vld [vmem:[#allocation5 + $0x340] sm:$0xff] }
  0x63   : > { %624 = vmatpush.msrb.mxu2 %v331_v21  ;;  %599 = vmatpush.msrb.mxu1 %v438_v24  ;;  %v368_v6 = vld [vmem:[#allocation5 + $0x2f0] sm:$0xff]  ;;  %v351_v7 = vld [vmem:[#allocation5 + $0x268] sm:$0xff]  ;;  %v453_v8 = vld [vmem:[#allocation5 + $0x598] sm:$0xff] }
  0x64   : > { %647 = vmatpush.msrb.mxu3 %v427_v22  ;;  %578 = vmatpush.msrb.mxu0 %v330_v27  ;;  %v1402_v9 = vld [vmem:[%s1382_s20 + $0x10] sm:$0xff]  ;;  %v362_v11 = vld [vmem:[#allocation5 + $0x2c0] sm:$0xff]  ;;  %v345_v13 = vld [vmem:[#allocation5 + $0x238] sm:$0xff] }
  0x65   : > { %625 = vmatpush.msrb.mxu2 %v325_v25  ;;  %600 = vmatpush.msrb.mxu1 %v432_v28  ;;  %v372_v10 = vld [vmem:[#allocation5 + $0x310] sm:$0xff]  ;;  %v447_v14 = vld [vmem:[#allocation5 + $0x568] sm:$0xff]  ;;  %v1407_v15 = vld [vmem:[%s1382_s20 + $0x18] sm:$0xff] }
  0x66   : > { %648 = vmatpush.msrb.mxu3 %v421_v26  ;;  %579 = vmatpush.msrb.mxu0 %v324_v31  ;;  %v464_v12 = vld [vmem:[#allocation5 + $0x5f0] sm:$0xff]  ;;  %v458_v17 = vld [vmem:[#allocation5 + $0x5c0] sm:$0xff]  ;;  %v339_v18 = vld [vmem:[#allocation5 + $0x208] sm:$0xff] }
  0x67   : > { %626 = vmatpush.msrb.mxu2 %v319_v29  ;;  %601 = vmatpush.msrb.mxu1 %v426_v32  ;;  %v356_v16 = vld [vmem:[#allocation5 + $0x290] sm:$0xff]  ;;  %v441_v19 = vld [vmem:[#allocation5 + $0x538] sm:$0xff]  ;;  %v350_v20 = vld [vmem:[#allocation5 + $0x260] sm:$0xff] }
  0x68   : > { %649 = vmatpush.msrb.mxu3 %v415_v30  ;;  %580 = vmatpush.msrb.mxu0 %v318_v35  ;;  %v452_v21 = vld [vmem:[#allocation5 + $0x590] sm:$0xff]  ;;  %v333_v22 = vld [vmem:[#allocation5 + $0x1d8] sm:$0xff]  ;;  %v435_v23 = vld [vmem:[#allocation5 + $0x508] sm:$0xff] }
  0x69   : > { %627 = vmatpush.msrb.mxu2 %v313_v33  ;;  %602 = vmatpush.msrb.mxu1 %v420_v36  ;;  %v344_v24 = vld [vmem:[#allocation5 + $0x230] sm:$0xff]  ;;  %v446_v25 = vld [vmem:[#allocation5 + $0x560] sm:$0xff]  ;;  %v327_v26 = vld [vmem:[#allocation5 + $0x1a8] sm:$0xff] }
  0x6a   : > { %650 = vmatpush.msrb.mxu3 %v409_v34  ;;  %581 = vmatpush.msrb.mxu0 %v312_v39  ;;  %v429_v27 = vld [vmem:[#allocation5 + $0x4d8] sm:$0xff]  ;;  %v338_v28 = vld [vmem:[#allocation5 + $0x200] sm:$0xff]  ;;  %v440_v29 = vld [vmem:[#allocation5 + $0x530] sm:$0xff] }
  0x6b   : > { %628 = vmatpush.msrb.mxu2 %v307_v37  ;;  %603 = vmatpush.msrb.mxu1 %v414_v40  ;;  %v321_v30 = vld [vmem:[#allocation5 + $0x178] sm:$0xff]  ;;  %v423_v31 = vld [vmem:[#allocation5 + $0x4a8] sm:$0xff]  ;;  %v332_v32 = vld [vmem:[#allocation5 + $0x1d0] sm:$0xff] }
  0x6c   : > { %651 = vmatpush.msrb.mxu3 %v403_v38  ;;  %582 = vmatpush.msrb.mxu0 %v306_v43  ;;  %v434_v33 = vld [vmem:[#allocation5 + $0x500] sm:$0xff]  ;;  %v315_v34 = vld [vmem:[#allocation5 + $0x148] sm:$0xff]  ;;  %v417_v35 = vld [vmem:[#allocation5 + $0x478] sm:$0xff] }
  0x6d   : > { %629 = vmatpush.msrb.mxu2 %v301_v41  ;;  %604 = vmatpush.msrb.mxu1 %v408_v44  ;;  %v326_v36 = vld [vmem:[#allocation5 + $0x1a0] sm:$0xff]  ;;  %v428_v37 = vld [vmem:[#allocation5 + $0x4d0] sm:$0xff]  ;;  %v309_v38 = vld [vmem:[#allocation5 + $0x118] sm:$0xff] }
  0x6e   : > { %652 = vmatpush.msrb.mxu3 %v397_v42  ;;  %583 = vmatpush.msrb.mxu0 %v300_v47  ;;  %v411_v39 = vld [vmem:[#allocation5 + $0x448] sm:$0xff]  ;;  %v320_v40 = vld [vmem:[#allocation5 + $0x170] sm:$0xff]  ;;  %v422_v41 = vld [vmem:[#allocation5 + $0x4a0] sm:$0xff] }
  0x6f   : > { %630 = vmatpush.msrb.mxu2 %v295_v45  ;;  %605 = vmatpush.msrb.mxu1 %v402_v48  ;;  %v303_v42 = vld [vmem:[#allocation5 + $0xe8] sm:$0xff]  ;;  %v405_v43 = vld [vmem:[#allocation5 + $0x418] sm:$0xff]  ;;  %v314_v44 = vld [vmem:[#allocation5 + $0x140] sm:$0xff] }
  0x70   : > { %653 = vmatpush.msrb.mxu3 %v391_v46  ;;  %542 = vmatmul.f32.vlgmr.msra.gmra.mxu2 %v1393_v51  ;;  %v416_v45 = vld [vmem:[#allocation5 + $0x470] sm:$0xff]  ;;  %v297_v46 = vld [vmem:[#allocation5 + $0xb8] sm:$0xff]  ;;  %v399_v47 = vld [vmem:[#allocation5 + $0x3e8] sm:$0xff] }
  0x71   : > { %631 = vmatpush.msrb.mxu2 %v289_v49  ;;  %584 = vmatpush.msrb.mxu0 %v294_v52  ;;  %v308_v48 = vld [vmem:[#allocation5 + $0x110] sm:$0xff]  ;;  %v410_v49 = vld [vmem:[#allocation5 + $0x440] sm:$0xff]  ;;  %v393_v52 = vld [vmem:[#allocation5 + $0x3b8] sm:$0xff] }
  0x72   : > { %654 = vmatpush.msrb.mxu3 %v385_v50  ;;  %606 = vmatpush.msrb.mxu1 %v396_v54  ;;  %v291_v50 = vld [vmem:[#allocation5 + $0x88] sm:$0xff]  ;;  %v404_v54 = vld [vmem:[#allocation5 + $0x410] sm:$0xff] }
  0x73   : > { %632 = vmatpush.msrb.mxu2 %v283_v53  ;;  %585 = vmatpush.msrb.mxu0 %v288_v56  ;;  %v302_v53 = vld [vmem:[#allocation5 + $0xe0] sm:$0xff]  ;;  %v387_v56 = vld [vmem:[#allocation5 + $0x388] sm:$0xff] }
  0x74   : > { %655 = vmatpush.msrb.mxu3 %v379_v55  ;;  %607 = vmatpush.msrb.mxu1 %v390_v60  ;;  %v285_v55 = vld [vmem:[#allocation5 + $0x58] sm:$0xff]  ;;  %v279_v60 = vld [vmem:[#allocation5 + $0x28] sm:$0xff] }
  0x75   : > { %633 = vmatpush.msrb.mxu2 %v277_v57  ;;  %565 = vmatmul.f32.vlgmr.msra.gmra.mxu3 %v1397_v58  ;;  %v296_v57 = vld [vmem:[#allocation5 + $0xb0] sm:$0xff] }
  0x76   : > { %656 = vmatpush.msrb.mxu3 %v373_v61  ;;  %586 = vmatpush.msrb.mxu0 %v282_v62  ;;  %v381_v61 = vld [vmem:[#allocation5 + $0x358] sm:$0xff]  ;;  %v290_v62 = vld [vmem:[#allocation5 + $0x80] sm:$0xff] }
  0x77   : > { %710 = vmatpush.msra.mxu2 %v369_v59  ;;  %608 = vmatpush.msrb.mxu1 %v384_v1  ;;  %v398_v59 = vld [vmem:[#allocation5 + $0x3e0] sm:$0xff]  ;;  %v284_v1 = vld [vmem:[#allocation5 + $0x50] sm:$0xff] }
  0x78   : > { %733 = vmatpush.msra.mxu3 %v465_v0  ;;  %496 = vmatmul.f32.vlgmr.msra.gmra.mxu0 %v1393_v51  ;;  %v375_v0 = vld [vmem:[#allocation5 + $0x328] sm:$0xff] }
  0x79   : > { %711 = vmatpush.msra.mxu2 %v363_v63  ;;  %587 = vmatpush.msrb.mxu0 %v276_v4  ;;  %v392_v63 = vld [vmem:[#allocation5 + $0x3b0] sm:$0xff] }
  0x7a   : > { %734 = vmatpush.msra.mxu3 %v459_v3  ;;  %609 = vmatpush.msrb.mxu1 %v378_v5  ;;  %v278_v3 = vld [vmem:[#allocation5 + $0x20] sm:$0xff]  ;;  %v380_v4 = vld [vmem:[#allocation5 + $0x350] sm:$0xff] }
  0x7b   : > { %712 = vmatpush.msra.mxu2 %v357_v2  ;;  %664 = vmatpush.msra.mxu0 %v368_v6  ;;  %v386_v2 = vld [vmem:[#allocation5 + $0x380] sm:$0xff] }
  0x7c   : > { %735 = vmatpush.msra.mxu3 %v453_v8  ;;  %519 = vmatmul.f32.vlgmr.msra.gmra.mxu1 %v1397_v58  ;;  %v374_v5 = vld [vmem:[#allocation5 + $0x320] sm:$0xff] }
  0x7d   : > { %713 = vmatpush.msra.mxu2 %v351_v7  ;;  %610 = vmatpush.msrb.mxu1 %v372_v10  ;;  %v1428_v6 = vld [vmem:[#allocation7] sm:$0x3f] }
  0x7e   : > { %545 = vmatmul.f32.gmra.mxu2 %v1402_v9  ;;  %665 = vmatpush.msra.mxu0 %v362_v11  ;;  %v469_v7 = vperm.slane %v1428_v6, 1  ;;  %v468_v8 = vperm.slane %v1428_v6, 0 }
  0x7f   : > { %687 = vmatpush.msra.mxu1 %v464_v12  ;;  %714 = vmatpush.msra.mxu2 %v345_v13 }
  0x80   : > { %736 = vmatpush.msra.mxu3 %v447_v14  ;;  %666 = vmatpush.msra.mxu0 %v356_v16 }
  0x81   : > { %568 = vmatmul.f32.gmra.mxu3 %v1407_v15  ;;  %688 = vmatpush.msra.mxu1 %v458_v17 }
  0x82   : > { %715 = vmatpush.msra.mxu2 %v339_v18  ;;  %737 = vmatpush.msra.mxu3 %v441_v19 }
  0x83   : > { %667 = vmatpush.msra.mxu0 %v350_v20  ;;  %689 = vmatpush.msra.mxu1 %v452_v21 }
  0x84   : > { %716 = vmatpush.msra.mxu2 %v333_v22  ;;  %738 = vmatpush.msra.mxu3 %v435_v23  ;;  %v471_v23 = vperm.slane %v1428_v6, 3 }
  0x85   : > { %499 = vmatmul.f32.gmra.mxu0 %v1402_v9  ;;  %690 = vmatpush.msra.mxu1 %v446_v25 }
  0x86   : > { %668 = vmatpush.msra.mxu0 %v344_v24  ;;  %717 = vmatpush.msra.mxu2 %v327_v26  ;;  %v470_v24 = vperm.slane %v1428_v6, 2 }
  0x87   : > { %739 = vmatpush.msra.mxu3 %v429_v27  ;;  %522 = vmatmul.f32.gmra.mxu1 %v1407_v15 }
  0x88   : > { %634 = vmatmul.f32.vlgmr.msrb.gmra.mxu2 %v1393_v51  ;;  %669 = vmatpush.msra.mxu0 %v338_v28 }
  0x89   : > { %691 = vmatpush.msra.mxu1 %v440_v29  ;;  %718 = vmatpush.msra.mxu2 %v321_v30 }
  0x8a   : > { %740 = vmatpush.msra.mxu3 %v423_v31  ;;  %670 = vmatpush.msra.mxu0 %v332_v32 }
  0x8b   : > { %657 = vmatmul.f32.vlgmr.msrb.gmra.mxu3 %v1397_v58  ;;  %692 = vmatpush.msra.mxu1 %v434_v33 }
  0x8c   : > { %719 = vmatpush.msra.mxu2 %v315_v34  ;;  %741 = vmatpush.msra.mxu3 %v417_v35 }
  0x8d   : > { %671 = vmatpush.msra.mxu0 %v326_v36  ;;  %693 = vmatpush.msra.mxu1 %v428_v37 }
  0x8e   : > { %720 = vmatpush.msra.mxu2 %v309_v38  ;;  %742 = vmatpush.msra.mxu3 %v411_v39 }
  0x8f   : > { %588 = vmatmul.f32.vlgmr.msrb.gmra.mxu0 %v1393_v51  ;;  %694 = vmatpush.msra.mxu1 %v422_v41  ;;  %v472_v41 = vperm.slane %v1428_v6, 4 }
  0x90   : > { %672 = vmatpush.msra.mxu0 %v320_v40  ;;  %721 = vmatpush.msra.mxu2 %v303_v42  ;;  %v473_v42 = vperm.slane %v1428_v6, 5 }
  0x91   : > { %743 = vmatpush.msra.mxu3 %v405_v43  ;;  %611 = vmatmul.f32.vlgmr.msrb.gmra.mxu1 %v1397_v58 }
  0x92   : > { %637 = vmatmul.f32.gmra.mxu2 %v1402_v9  ;;  %673 = vmatpush.msra.mxu0 %v314_v44 }
  0x93   : > { %695 = vmatpush.msra.mxu1 %v416_v45  ;;  %722 = vmatpush.msra.mxu2 %v297_v46 }
  0x94   : > { %744 = vmatpush.msra.mxu3 %v399_v47  ;;  %674 = vmatpush.msra.mxu0 %v308_v48 }
  0x95   : > { %660 = vmatmul.f32.gmra.mxu3 %v1407_v15  ;;  %696 = vmatpush.msra.mxu1 %v410_v49 }
  0x96   : > { %723 = vmatpush.msra.mxu2 %v291_v50  ;;  %745 = vmatpush.msra.mxu3 %v393_v52 }
  0x97   : > { %675 = vmatpush.msra.mxu0 %v302_v53  ;;  %697 = vmatpush.msra.mxu1 %v404_v54 }
  0x98   : > { %724 = vmatpush.msra.mxu2 %v285_v55  ;;  %746 = vmatpush.msra.mxu3 %v387_v56 }
  0x99   : > { %591 = vmatmul.f32.gmra.mxu0 %v1402_v9  ;;  %698 = vmatpush.msra.mxu1 %v398_v59 }
  0x9a   : > { %676 = vmatpush.msra.mxu0 %v296_v57  ;;  %725 = vmatpush.msra.mxu2 %v279_v60 }
  0x9b   : > { %747 = vmatpush.msra.mxu3 %v381_v61  ;;  %614 = vmatmul.f32.gmra.mxu1 %v1407_v15 }
  0x9c   : > { %726 = vmatmul.f32.vlgmr.msra.gmra.mxu2 %v1393_v51  ;;  %677 = vmatpush.msra.mxu0 %v290_v62 }
  0x9d   : > { %699 = vmatpush.msra.mxu1 %v392_v63  ;;  %748 = vmatpush.msra.mxu3 %v375_v0 }
  0x9e   : > { %749 = vmatmul.f32.vlgmr.msra.gmra.mxu3 %v1397_v58  ;;  %678 = vmatpush.msra.mxu0 %v284_v1 }
  0x9f   : > { %700 = vmatpush.msra.mxu1 %v386_v2 }
  0xa0   : > { %679 = vmatpush.msra.mxu0 %v278_v3 }
  0xa1   : > { %701 = vmatpush.msra.mxu1 %v380_v4  ;;  %680 = vmatmul.f32.vlgmr.msra.gmra.mxu0 %v1393_v51 }
  0xa3   : > { %702 = vmatpush.msra.mxu1 %v374_v5 }
  0xa4   : > { %729 = vmatmul.f32.gmra.mxu2 %v1402_v9  ;;  %703 = vmatmul.f32.vlgmr.msra.gmra.mxu1 %v1397_v58 }
  0xa6   : > { %752 = vmatmul.f32.gmra.mxu3 %v1407_v15 }
  0xa9   : > { %683 = vmatmul.f32.gmra.mxu0 %v1402_v9 }
  0xac   : > { %706 = vmatmul.f32.gmra.mxu1 %v1407_v15 }
  0xf3   : > { %v543_v10 = vpop.f32.mrf.mxu2 }
  0xf4   : > { %v544_v11 = vadd.f32 %v543_v10, %v469_v7 }
  0xf5   : > { %v497_v51 = vpop.f32.mrf.mxu0 }
  0xf6   : > { %v498_v12 = vadd.f32 %v497_v51, %v468_v8 }
  0xf8   : > { %v566_v13 = vpop.f32.mrf.mxu3 }
  0xf9   : > { %v567_v14 = vadd.f32 %v566_v13, %v544_v11  ;;  %v520_v58 = vpop.f32.mrf.mxu1 }
  0xfa   : > { %v521_v16 = vadd.f32 %v520_v58, %v498_v12 }
  0xfb   : > { %757 = vst [vmem:[%s1433_s22 + $0x8] sm:$0xff] %v567_v14 }
  0xfc   : > { %756 = vst [vmem:[%s1433_s22] sm:$0xff] %v521_v16 }
 0x101   : > { %v546_v9 = vpop.f32.mrf.mxu2 }
 0x102   : > { %v500_v15 = vpop.f32.mrf.mxu0  ;;  %v547_v17 = vadd.f32 %v546_v9, %v469_v7 }
 0x103   : > { %v501_v18 = vadd.f32 %v500_v15, %v468_v8 }
 0x104   : > { %v569_v19 = vpop.f32.mrf.mxu3  ;;  %v523_v20 = vpop.f32.mrf.mxu1 }
 0x105   : > { %v570_v21 = vadd.f32 %v569_v19, %v547_v17  ;;  %v524_v22 = vadd.f32 %v523_v20, %v501_v18 }
 0x107   : > { %763 = vst [vmem:[%s1433_s22 + $0x38] sm:$0xff] %v570_v21 }
 0x108   : > { %762 = vst [vmem:[%s1433_s22 + $0x30] sm:$0xff] %v524_v22 }
 0x10b   : > { %v635_v25 = vpop.f32.mrf.mxu2 }
 0x10c   : > { %v589_v26 = vpop.f32.mrf.mxu0  ;;  %v636_v27 = vadd.f32 %v635_v25, %v471_v23 }
 0x10d   : > { %v590_v28 = vadd.f32 %v589_v26, %v470_v24 }
 0x10e   : > { %v658_v29 = vpop.f32.mrf.mxu3  ;;  %v612_v30 = vpop.f32.mrf.mxu1 }
 0x10f   : > { %v659_v31 = vadd.f32 %v658_v29, %v636_v27  ;;  %v613_v32 = vadd.f32 %v612_v30, %v590_v28 }
 0x111   : > { %759 = vst [vmem:[%s1433_s22 + $0x18] sm:$0xff] %v659_v31 }
 0x112   : > { %758 = vst [vmem:[%s1433_s22 + $0x10] sm:$0xff] %v613_v32 }
 0x115   : > { %v638_v33 = vpop.f32.mrf.mxu2 }
 0x116   : > { %v592_v34 = vpop.f32.mrf.mxu0  ;;  %v639_v35 = vadd.f32 %v638_v33, %v471_v23 }
 0x117   : > { %v593_v36 = vadd.f32 %v592_v34, %v470_v24 }
 0x118   : > { %v661_v37 = vpop.f32.mrf.mxu3  ;;  %v615_v38 = vpop.f32.mrf.mxu1 }
 0x119   : > { %v662_v39 = vadd.f32 %v661_v37, %v639_v35  ;;  %v616_v40 = vadd.f32 %v615_v38, %v593_v36 }
 0x11b   : > { %765 = vst [vmem:[%s1433_s22 + $0x48] sm:$0xff] %v662_v39 }
 0x11c   : > { %764 = vst [vmem:[%s1433_s22 + $0x40] sm:$0xff] %v616_v40 }
 0x11e   : > { %v681_v43 = vpop.f32.mrf.mxu0 }
 0x11f   : > { %v727_v44 = vpop.f32.mrf.mxu2  ;;  %v682_v45 = vadd.f32 %v681_v43, %v472_v41 }
 0x120   : > { %v728_v46 = vadd.f32 %v727_v44, %v473_v42 }
 0x121   : > { %v704_v47 = vpop.f32.mrf.mxu1  ;;  %v750_v48 = vpop.f32.mrf.mxu3 }
 0x122   : > { %v705_v49 = vadd.f32 %v704_v47, %v682_v45  ;;  %v751_v50 = vadd.f32 %v750_v48, %v728_v46 }
 0x124   : > { %760 = vst [vmem:[%s1433_s22 + $0x20] sm:$0xff] %v705_v49 }
 0x125   : > { %761 = vst [vmem:[%s1433_s22 + $0x28] sm:$0xff] %v751_v50 }
 0x126   : > { %v684_v52 = vpop.f32.mrf.mxu0 }
 0x127   : > { %v730_v53 = vpop.f32.mrf.mxu2  ;;  %v685_v54 = vadd.f32 %v684_v52, %v472_v41 }
 0x128   : > { %v731_v55 = vadd.f32 %v730_v53, %v473_v42 }
 0x129   : > { %v707_v56 = vpop.f32.mrf.mxu1  ;;  %v753_v57 = vpop.f32.mrf.mxu3 }
 0x12a   : > { %v708_v59 = vadd.f32 %v707_v56, %v685_v54  ;;  %v754_v60 = vadd.f32 %v753_v57, %v731_v55 }
 0x12c   : > { %766 = vst [vmem:[%s1433_s22 + $0x50] sm:$0xff] %v708_v59 }
 0x12d   : > { %767 = vst [vmem:[%s1433_s22 + $0x58] sm:$0xff] %v754_v60 }
 0x12e   : > { %1153 = shalt.err (!%p1150_p13)
}
 0x12f   : > { %s1236_s26 = smov 768   ;;  %s1237_s20 = smov 48  }
 0x130   : > { %941 = dma.vmem_to_hbm [thread:$0]  (%p1353_p5), %s787_s8, 1536, %s789_s9, %s769_s10, %s1236_s26, %s1236_s26, %s1237_s20  }
 0x131 PF: > { %s1521_s12 = sld [smem:[#allocation12_spill]]  ;;  %p963_p0 = scmp.ge.s32.totalorder %s1228_s19, 2 }
 0x133   : > { %p955_p3 = pnand %p963_p0, %p1317_p6 }
 0x135   : > { %p956_p7 = pneg %p955_p3 }
 0x137   : > { %s803_s24 = sand.u32 1, %s1521_s12  }
 0x138   : > { %s804_s29 = scalar_lea.sflag [#allocation4], %s803_s24 }
 0x139   : > { %1195 = dma.done.wait (%p956_p7), %s804_s29, 1536  }
 0x13a   : > { %1197 = vsyncadd (%p956_p7), %s804_s29, 4294965760  ;;  %s20_s19 = sadd.s32 1, %s1228_s19   ;;  %s1523_s28 = sld [smem:[#allocation14_spill]] }
 0x13b   : > { %p17_p9 = scmp.ge.s32.totalorder %s20_s19, 6   ;;  %s1524_s12 = smov %s1204_s13 }
 0x13c   : > { %s1525_s13 = smov %s1208_s14  ;;  %s1526_s14 = smov %s1366_s1 }
 0x13d   : > { %s1527_s15 = smov %s1220_s17  ;;  %s1528_s16 = smov %s1224_s18 }
 0x13e   : > { %s1530_s18 = smov %s1536_s21  ;;  %19 = sbr.rel (!%p17_p9) target bundleno = 11 (0xb), region = 87 }
 0x140   : > { %s1529_s17 = smov %s1523_s28 }
 0x143   :  { %810 = vsyncpa [#allocation3], 1 }
 0x144   :  { %812 = vsyncpa [#allocation3 + $0x1], 1 }
 0x145   :  { %813 = vsyncpa [#allocation6], 1 }
 0x146   :  { %814 = vsyncpa [#allocation4], 1 }
 0x147   :  { %816 = vsyncpa [#allocation4 + $0x1], 1 }

</bundles_post_ra>
